<compile_context>
chip_gen: v5e
topology: v5e:2x2
jax: 0.10.0
libtpu: 0.0.40
codegen_flags: <defaults>
</compile_context>

<pallas_src>
import math
import functools

import jax
import jax.numpy as jnp
from jax import lax
from jax.experimental import pallas as pl
from jax.experimental.pallas import tpu as pltpu

_NEG_INF = -1e30          # finite "-inf": avoids inf-inf NaN if rows ever get fully masked
_VMEM_LIMIT = 48 * 1024 * 1024


def _pick_tile(n, target):
    """Largest tile <= target that divides n and is sublane aligned (mult of 8),
    falling back to the full dimension (always a legal BlockSpec block)."""
    if n <= target:
        return n
    t = (target // 8) * 8
    while t >= 8:
        if n % t == 0:
            return t
        t -= 8
    return n


# ---------------- projection (matmul + bias) kernel ----------------

def _linear_kernel(x_ref, w_ref, b_ref, o_ref):
    acc = jnp.dot(x_ref[...], w_ref[...], preferred_element_type=jnp.float32)
    o_ref[...] = (acc + b_ref[...]).astype(o_ref.dtype)


def _linear(x2d, w, b, out_dtype, *, block_rows=256):
    rows, k_dim = x2d.shape
    n_dim = w.shape[1]
    tr = _pick_tile(rows, block_rows)
    return pl.pallas_call(
        _linear_kernel,
        out_shape=jax.ShapeDtypeStruct((rows, n_dim), out_dtype),
        grid_spec=pltpu.PrefetchScalarGridSpec(
            num_scalar_prefetch=0,
            grid=(rows // tr,),
            in_specs=[
                pl.BlockSpec((tr, k_dim), lambda i: (i, 0)),
                pl.BlockSpec((k_dim, n_dim), lambda i: (0, 0)),   # resident weight
                pl.BlockSpec((1, n_dim), lambda i: (0, 0)),
            ],
            out_specs=pl.BlockSpec((tr, n_dim), lambda i: (i, 0)),
        ),
        compiler_params=pltpu.CompilerParams(
            dimension_semantics=("parallel",),
            vmem_limit_bytes=_VMEM_LIMIT),
    )(x2d, w, b)


# ---------------- flash attention kernel (GQA-grouped) ----------------

def _flash_kernel(q_ref, k_ref, v_ref, o_ref, m_sc, l_sc, acc_sc, *,
                  rep, tq, tk, causal):
    # q_ref: (1, rep, tq, D); k_ref / v_ref: (1, tk, D); o_ref: (1, rep, tq, D)
    qi = pl.program_id(1)
    ki = pl.program_id(2)
    nk = pl.num_programs(2)

    @pl.when(ki == 0)
    def _init():
        m_sc[...] = jnp.full(m_sc.shape, _NEG_INF, m_sc.dtype)
        l_sc[...] = jnp.zeros(l_sc.shape, l_sc.dtype)
        acc_sc[...] = jnp.zeros(acc_sc.shape, acc_sc.dtype)

    def _compute():
        q = q_ref[...].reshape(rep * tq, -1)          # (rep*tq, D) all heads of group
        k = k_ref[...].reshape(tk, -1)                # (tk, D)
        v = v_ref[...].reshape(tk, -1)                # (tk, D)
        # q @ k^T without materializing a transposed copy of k.
        s = lax.dot_general(q, k, (((1,), (1,)), ((), ())),
                            preferred_element_type=jnp.float32)   # (rep*tq, tk)
        if causal:
            q_pos = qi * tq + (lax.broadcasted_iota(jnp.int32, (rep * tq, tk), 0) % tq)
            k_pos = ki * tk + lax.broadcasted_iota(jnp.int32, (rep * tq, tk), 1)
            s = jnp.where(q_pos >= k_pos, s, _NEG_INF)
        m_prev = m_sc[...]
        m_new = jnp.maximum(m_prev, jnp.max(s, axis=-1, keepdims=True))
        alpha = jnp.exp(m_prev - m_new)
        p = jnp.exp(s - m_new)                                     # f32 softmax math
        l_sc[...] = alpha * l_sc[...] + jnp.sum(p, axis=-1, keepdims=True)
        acc_sc[...] = alpha * acc_sc[...] + jnp.dot(
            p.astype(v.dtype), v, preferred_element_type=jnp.float32)
        m_sc[...] = m_new

    if causal:
        # Skip KV tiles that lie entirely above the diagonal.
        @pl.when(ki * tk <= qi * tq + (tq - 1))
        def _():
            _compute()
    else:
        _compute()

    @pl.when(ki == nk - 1)
    def _finalize():
        ctx = acc_sc[...] * pl.reciprocal(l_sc[...], approx=True)
        o_ref[...] = ctx.reshape(o_ref.shape).astype(o_ref.dtype)


def _flash_attention(q, k, v, *, causal, block_q=128, block_k=128):
    # q: (BG, rep, S, D); k, v: (BG, S, D)   (BG = batch * num_kv_heads)
    BG, rep, S, D = q.shape
    tq = _pick_tile(S, block_q)
    tk = _pick_tile(S, block_k)
    grid = (BG, S // tq, S // tk)

    if causal:
        def kv_map(bg, qi, ki):
            # Clamp to the diagonal tile: skipped (fully masked) grid steps
            # re-use the already-resident block instead of DMAing unused K/V.
            return (bg, jnp.minimum(ki, (qi * tq + tq - 1) // tk), 0)
    else:
        def kv_map(bg, qi, ki):
            return (bg, ki, 0)

    kernel = functools.partial(_flash_kernel, rep=rep, tq=tq, tk=tk, causal=causal)
    return pl.pallas_call(
        kernel,
        out_shape=jax.ShapeDtypeStruct((BG, rep, S, D), q.dtype),
        grid_spec=pltpu.PrefetchScalarGridSpec(
            num_scalar_prefetch=0,
            grid=grid,
            in_specs=[
                pl.BlockSpec((1, rep, tq, D), lambda bg, qi, ki: (bg, 0, qi, 0)),
                pl.BlockSpec((1, tk, D), kv_map),
                pl.BlockSpec((1, tk, D), kv_map),
            ],
            out_specs=pl.BlockSpec((1, rep, tq, D),
                                   lambda bg, qi, ki: (bg, 0, qi, 0)),
            scratch_shapes=[
                pltpu.VMEM((rep * tq, 1), jnp.float32),   # running max
                pltpu.VMEM((rep * tq, 1), jnp.float32),   # running denominator
                pltpu.VMEM((rep * tq, D), jnp.float32),   # context accumulator
            ],
        ),
        compiler_params=pltpu.CompilerParams(
            dimension_semantics=("parallel", "parallel", "arbitrary"),
            vmem_limit_bytes=_VMEM_LIMIT),
    )(q, k, v)


# ---------------- full MHA forward ----------------

def mha_forward(x, params, *, num_heads, num_heads_kv, head_dim,
                causal=True, softmax_scale=None, compute_dtype=jnp.bfloat16,
                block_q=128, block_k=128, block_rows=256):
    B, S, E = x.shape
    rep = num_heads // num_heads_kv
    qd = num_heads * head_dim
    kvd = num_heads_kv * head_dim
    qkv_dim = qd + 2 * kvd
    scale = softmax_scale if softmax_scale is not None else 1.0 / math.sqrt(head_dim)

    # torch nn.Linear layout: weight (out_features, in_features).
    w_in = jnp.asarray(params["w_in"], jnp.float32)     # (qkv_dim, E)
    b_in = jnp.asarray(params["b_in"], jnp.float32)     # (qkv_dim,)
    w_out = jnp.asarray(params["w_out"], jnp.float32)   # (E, qd)
    b_out = jnp.asarray(params["b_out"], jnp.float32)   # (E,)

    # Fold the softmax scale into the q rows of in_proj (zero runtime cost).
    row_scale = jnp.concatenate(
        [jnp.full((qd,), scale, jnp.float32), jnp.ones((2 * kvd,), jnp.float32)])
    w_in = w_in * row_scale[:, None]
    b_in = b_in * row_scale

    w_in_t = w_in.T.astype(compute_dtype)                # (E, qkv_dim), bf16 for MXU
    w_out_t = w_out.T.astype(compute_dtype)              # (qd, E)
    b_in2 = b_in.reshape(1, qkv_dim)                     # biases stay f32
    b_out2 = b_out.reshape(1, E)

    # in_proj
    x2d = x.reshape(B * S, E).astype(compute_dtype)
    qkv = _linear(x2d, w_in_t, b_in2, compute_dtype, block_rows=block_rows)

    # split q/k/v; GQA: q head h uses kv head h // rep (repeat_interleave order)
    q = qkv[:, :qd].reshape(B, S, num_heads_kv, rep, head_dim)
    q = jnp.transpose(q, (0, 2, 3, 1, 4)).reshape(B * num_heads_kv, rep, S, head_dim)
    k = qkv[:, qd:qd + kvd].reshape(B, S, num_heads_kv, head_dim)
    k = jnp.transpose(k, (0, 2, 1, 3)).reshape(B * num_heads_kv, S, head_dim)
    v = qkv[:, qd + kvd:].reshape(B, S, num_heads_kv, head_dim)
    v = jnp.transpose(v, (0, 2, 1, 3)).reshape(B * num_heads_kv, S, head_dim)

    ctx = _flash_attention(q, k, v, causal=causal, block_q=block_q, block_k=block_k)
    ctx = ctx.reshape(B, num_heads_kv, rep, S, head_dim)
    ctx2d = jnp.transpose(ctx, (0, 3, 1, 2, 4)).reshape(B * S, qd)

    # out_proj (output in the input dtype)
    out2d = _linear(ctx2d.astype(compute_dtype), w_out_t, b_out2, x.dtype,
                    block_rows=block_rows)
    return out2d.reshape(B, S, E)


# ---------------- pure-JAX reference (PyTorch forward, cache_params=None) ----------------

def mha_reference(x, params, *, num_heads, num_heads_kv, head_dim,
                  causal=True, softmax_scale=None):
    B, S, E = x.shape
    scale = softmax_scale if softmax_scale is not None else 1.0 / math.sqrt(head_dim)
    qkv = jnp.einsum('bse,oe->bso', x, params["w_in"]) + params["b_in"]
    qd = num_heads * head_dim
    q = qkv[..., :qd].reshape(B, S, num_heads, head_dim)
    kv = qkv[..., qd:].reshape(B, S, 2, num_heads_kv, head_dim)
    k, v = kv[:, :, 0], kv[:, :, 1]
    rep = num_heads // num_heads_kv
    k = jnp.repeat(k, rep, axis=2)
    v = jnp.repeat(v, rep, axis=2)
    s = jnp.einsum('bqhd,bkhd->bhqk', q, k) * scale
    if causal:
        mask = jnp.tril(jnp.ones((S, S), dtype=bool))
        s = jnp.where(mask, s, -jnp.inf)
    p = jax.nn.softmax(s, axis=-1)
    ctx = jnp.einsum('bhqk,bkhd->bqhd', p, v).reshape(B, S, num_heads * head_dim)
    return jnp.einsum('bso,eo->bse', ctx, params["w_out"]) + params["b_out"]


if __name__ == "__main__":
    def _run_case(B, S, E, num_heads, num_heads_kv, head_dim, case_idx):
        qkv_dim = head_dim * (num_heads + 2 * num_heads_kv)
        out_dim = head_dim * num_heads
        key = jax.random.fold_in(jax.random.PRNGKey(0), case_idx)
        kx, kwi, kbi, kwo, kbo = jax.random.split(key, 5)
        x = jax.random.normal(kx, (B, S, E), dtype=jnp.float32)
        params = {
            # torch nn.Linear layout: weight (out_features, in_features)
            "w_in": 0.02 * jax.random.normal(kwi, (qkv_dim, E), dtype=jnp.float32),
            "b_in": 0.02 * jax.random.normal(kbi, (qkv_dim,), dtype=jnp.float32),
            "w_out": 0.02 * jax.random.normal(kwo, (E, out_dim), dtype=jnp.float32),
            "b_out": 0.02 * jax.random.normal(kbo, (E,), dtype=jnp.float32),
        }
        out = mha_forward(x, params, num_heads=num_heads, num_heads_kv=num_heads_kv,
                          head_dim=head_dim, causal=True)
        out = jax.block_until_ready(out)
        ref = mha_reference(x, params, num_heads=num_heads, num_heads_kv=num_heads_kv,
                            head_dim=head_dim, causal=True)
        assert out.shape == (B, S, E)
        err = float(jnp.max(jnp.abs(out - ref)))
        assert jnp.allclose(out, ref, atol=2e-2, rtol=2e-2), f"mismatch, max abs err={err}"

    # Small module-consistent case (single q/kv tile).
    _run_case(B=2, S=8, E=32, num_heads=4, num_heads_kv=2, head_dim=8, case_idx=0)
    # Larger case exercising multi-tile flash path + causal tile skipping.
    _run_case(B=1, S=256, E=128, num_heads=4, num_heads_kv=2, head_dim=32, case_idx=1)

    # TODO(synk): d_conv>0 causal-conv path, mlp_dim>0 gated-MLP branch, rotary
    # embeddings and kv-cache decode paths are not exercised in this config.
    print("KERNEL_OK")
</pallas_src>

<mosaic_0001>
module attributes {stable_mosaic.version = 11 : i64} {
  func.func @_linear_kernel(%arg0: i32, %arg1: memref<16x32xbf16, #tpu.memory_space<vmem>>, %arg2: memref<32x64xbf16, #tpu.memory_space<vmem>>, %arg3: memref<1x64xf32, #tpu.memory_space<vmem>>, %arg4: memref<16x64xbf16, #tpu.memory_space<vmem>>) attributes {dimension_semantics = [#tpu.dimension_semantics<parallel>], iteration_bounds = array<i64: 1>, scalar_prefetch = 0 : i64, scratch_operands = 0 : i64, tpu.core_type = #tpu.core_type<tc>, window_params = [{transform_indices = @transform_0, window_bounds = array<i64: 16, 32>}, {pipeline_mode = #tpu.pipeline_mode<synchronous>, transform_indices = @transform_1, window_bounds = array<i64: 32, 64>}, {pipeline_mode = #tpu.pipeline_mode<synchronous>, transform_indices = @transform_2, window_bounds = array<i64: 1, 64>}, {transform_indices = @transform_3, window_bounds = array<i64: 16, 64>}]} {
    %c0 = arith.constant 0 : index
    %c0_0 = arith.constant 0 : index
    %0 = vector.load %arg1[%c0, %c0_0] : memref<16x32xbf16, #tpu.memory_space<vmem>>, vector<16x32xbf16>
    %c0_1 = arith.constant 0 : index
    %c0_2 = arith.constant 0 : index
    %1 = vector.load %arg2[%c0_1, %c0_2] : memref<32x64xbf16, #tpu.memory_space<vmem>>, vector<32x64xbf16>
    %cst = arith.constant dense<0.000000e+00> : vector<16x64xf32>
    %2 = tpu.matmul %0, %1, %cst {dimension_numbers = #tpu.dot_dimension_numbers<[1], [0], [0], [1], [0, 0, 1, 1], [], []>} : vector<16x32xbf16>, vector<32x64xbf16>, vector<16x64xf32> -> vector<16x64xf32>
    %c0_3 = arith.constant 0 : index
    %c0_4 = arith.constant 0 : index
    %3 = vector.load %arg3[%c0_3, %c0_4] : memref<1x64xf32, #tpu.memory_space<vmem>>, vector<1x64xf32>
    %4 = vector.broadcast %3 : vector<1x64xf32> to vector<16x64xf32>
    %5 = arith.addf %2, %4 : vector<16x64xf32>
    %6 = arith.truncf %5 : vector<16x64xf32> to vector<16x64xbf16>
    %c0_5 = arith.constant 0 : index
    %c0_6 = arith.constant 0 : index
    %7 = vector.load %arg4[%c0_5, %c0_6] : memref<16x64xbf16, #tpu.memory_space<vmem>>, vector<16x64xbf16>
    tpu.vector_store %arg4[%c0_5, %c0_6], %6 {strides = array<i32>} : memref<16x64xbf16, #tpu.memory_space<vmem>>, vector<16x64xbf16>,
    return
  }
  func.func @transform_0(%arg0: i32) -> (i32, i32) {
    %c0_i32 = arith.constant 0 : i32
    %c0_i32_0 = arith.constant 0 : i32
    return %arg0, %c0_i32 : i32, i32
  }
  func.func @transform_1(%arg0: i32) -> (i32, i32) {
    %c0_i32 = arith.constant 0 : i32
    %c0_i32_0 = arith.constant 0 : i32
    %c0_i32_1 = arith.constant 0 : i32
    return %c0_i32, %c0_i32_0 : i32, i32
  }
  func.func @transform_2(%arg0: i32) -> (i32, i32) {
    %c0_i32 = arith.constant 0 : i32
    %c0_i32_0 = arith.constant 0 : i32
    %c0_i32_1 = arith.constant 0 : i32
    return %c0_i32, %c0_i32_0 : i32, i32
  }
  func.func @transform_3(%arg0: i32) -> (i32, i32) {
    %c0_i32 = arith.constant 0 : i32
    %c0_i32_0 = arith.constant 0 : i32
    return %arg0, %c0_i32 : i32, i32
  }
}

</mosaic_0001>

<bundles_post_ra>
// kernel: tpu_custom_call.1
= control target key start
LH: loop header
LB: loop body
LE: loop exit
PB: predicated region body
PF: predicated region fallthrough
CT: control target
= control target key end

     0   :  { %8 = vsyncpa [#allocation3], 0  ;;  %s264_s0 = inlined_call_operand.hbm [shape: bf16[16,32], index: 0, kind: input, shape index: {}]   ;;  %s265_s1 = inlined_call_operand.hbm [shape: bf16[32,64], index: 1, kind: input, shape index: {}]   ;;  %s266_s2 = inlined_call_operand.vmem [shape: f32[1,64], index: 2, kind: input, shape index: {}]   ;;  %s267_s3 = inlined_call_operand.hbm [shape: bf16[16,64], index: 3, kind: output, shape index: {}]  }
   0x1   :  { %9 = vsyncpa [#allocation6], 0 }
   0x2   :  { %10 = vsyncpa [#allocation4], 0  ;;  %s15_s14 = sshll.u32 %s264_s0, 4  ;;  %s218_s15 = smov [#allocation2]   ;;  %s16_s14 = int_to_ptr.hbm [resolvable:$true] %s15_s14 }
   0x3   :  { %s17_s16 = sshll.u32 %s218_s15, 4  ;;  %s28_s19 = sshll.u32 %s265_s1, 4  ;;  %s18_s16 = int_to_ptr.vmem [resolvable:$true] %s17_s16  ;;  %s29_s19 = int_to_ptr.hbm [resolvable:$true] %s28_s19 }
   0x4   :  { %s219_s20 = smov 64   ;;  %s220_s21 = smov 4  }
   0x5   :  { %23 = dma.hbm_to_vmem [thread:$0]  %s16_s14, 128, %s18_s16, [#allocation3], %s219_s20, %s219_s20, %s220_s21  }
   0x6   :  { %s221_s22 = smov [#allocation5]  }
   0x7   :  { %s30_s23 = sshll.u32 %s221_s22, 4  ;;  %s31_s23 = int_to_ptr.vmem [resolvable:$true] %s30_s23 }
   0x8   :  { %36 = dma.hbm_to_vmem [thread:$0]  %s29_s19, 256, %s31_s23, [#allocation6], %s219_s20, %s219_s20, %s220_s21  }
   0x9   :  { %212 = dma.done.wait [#allocation3], 128  }
   0xa   :  { %213 = vsyncadd [#allocation3], 4294967168 }
   0xb   :  { %214 = dma.done.wait [#allocation6], 256  }
   0xc   :  { %215 = vsyncadd [#allocation6], 4294967040  ;;  %v133_v0 = vld [vmem:[#allocation5 + $0x8] sm:$0xff]  ;;  %v132_v1 = vld [vmem:[#allocation5] sm:$0xff]  ;;  %vm75_vm0 = vcmask 261120   ;;  %vm95_vm1 = vcmask 519168  }
   0xd   :  { %85 = vmatpush.bf16.msra.mxu0 %v133_v0  ;;  %v131_v2 = vld [vmem:[#allocation2] sm:$0xff]  ;;  %s222_s24 = smov [#allocation7]   ;;  %s104_s28 = sshll.u32 %s267_s3, 4  ;;  %s105_s28 = int_to_ptr.hbm [resolvable:$true] %s104_s28 }
   0xe   :  { %v139_v3 = vld [vmem:[%s266_s2] ss:$0 sm:$0xff]  ;;  %s102_s25 = sshll.u32 %s222_s24, 4  ;;  %s103_s25 = int_to_ptr.vmem [resolvable:$true] %s102_s25 }
  0x11   :  { %86 = vmatpush.bf16.msra.mxu0 %v132_v1 }
  0x14   :  { %130 = vmatmul.msk.bf16.vlgmr.msra.gmra.mxu0 %vm75_vm0, %v131_v2 }
  0x91   :  { %v88_v4 = vpop.f32.mrf.mxu0 }
  0x92   :  { %v89_v5 = vadd.f32 %v139_v3, %v88_v4 }
  0x94   :  { %v93_v6 = vpack.c.bf16 %v89_v5, %v89_v5 }
  0x96   :  { %96 = vst.msk [vmem:[#allocation7] sm:$0xf] %vm95_vm1, %v93_v6 }
  0x99   :  { %v90_v7 = vpop.f32.mrf.mxu0 }
  0x9a   :  { %v91_v8 = vadd.f32 %v139_v3, %v90_v7 }
  0x9c   :  { %v94_v9 = vpack.c.bf16 %v91_v8, %v91_v8 }
  0x9e   :  { %97 = vst.msk [vmem:[#allocation7 + $0x4] sm:$0xf] %vm95_vm1, %v94_v9 }
  0x9f   :  { %110 = dma.vmem_to_hbm [thread:$0]  %s103_s25, 128, %s105_s28, [#allocation4], %s219_s20, %s219_s20, %s220_s21  }
  0xa0   :  { %216 = dma.done.wait [#allocation4], 128  }
  0xa1   :  { %217 = vsyncadd [#allocation4], 4294967168 }
  0xa2   :  { %115 = vsyncpa [#allocation3], 1 }
  0xa3   :  { %116 = vsyncpa [#allocation6], 1 }
  0xa4   :  { %117 = vsyncpa [#allocation4], 1 }

</bundles_post_ra>
